<compile_context>
chip_gen: v5e
topology: v5e:2x2
jax: 0.10.0
libtpu: 0.0.40
codegen_flags: <defaults>
</compile_context>

<pallas_src>
import jax
import jax.numpy as jnp
from jax.experimental import pallas as pl
from jax.experimental.pallas import tpu as pltpu

_LANE = 128     # f32 lane width
_SUBLANE = 8    # f32 sublane width


def _round_up(x, m):
    return ((x + m - 1) // m) * m


def _fused_affine_relu_kernel(s_ref, w_ref, b_ref, o_ref):
    # One MXU matmul (f32 accumulation) against the resident lane-padded fused
    # weight; bias add + ReLU on the VPU.
    a = o_ref.shape[-1]
    acc = jnp.dot(s_ref[...], w_ref[...], preferred_element_type=jnp.float32)
    # Store only the A real lanes: HBM output stays (B, A).  The masked vst is
    # hidden under the memory bottleneck at these FLOP counts.
    o_ref[...] = jnp.maximum(acc[:, :a] + b_ref[...], 0.0).astype(o_ref.dtype)


def fuse_params(w1, b1, w2, b2):
    """Fuse the two bias-ful Linears into one affine map, lane-pad the weight.

    Call ONCE per parameter update (hoisted out of the per-step forward path).
    Returns (w_eff [F, round_up(A,128)], b_eff [1, A]).
    """
    a = w2.shape[1]
    w_eff = jnp.dot(w1, w2, preferred_element_type=jnp.float32)        # [F, A]
    b_eff = jnp.dot(b1, w2, preferred_element_type=jnp.float32) + b2   # [A]
    a_pad = _round_up(a, _LANE)
    w_eff = jnp.pad(w_eff, ((0, 0), (0, a_pad - a)))                   # lane-dense compute
    return w_eff.astype(jnp.float32), b_eff.reshape(1, a).astype(jnp.float32)


def _choose_batch_tile(batch, max_rows_per_tile):
    """Batch tile: big enough to amortize per-step overhead, small enough for
    VMEM, and >=2 grid steps when possible so v7x megacore shards the batch."""
    b_ru = _round_up(max(batch, 1), _SUBLANE)
    n_steps = pl.cdiv(b_ru, max_rows_per_tile)
    if b_ru >= 2 * _SUBLANE:
        n_steps = max(n_steps, 2)
    tb = min(_round_up(pl.cdiv(b_ru, n_steps), _SUBLANE), max_rows_per_tile)
    grid = pl.cdiv(batch, tb)
    return tb, grid


def network_forward_fused(s, w_eff, b_eff, *, max_rows_per_tile=8192):
    """q = ReLU(s @ W_eff + b_eff).  s: [B, F] f32 -> q: [B, A] f32."""
    B, F = s.shape
    A = b_eff.shape[-1]
    A_pad = w_eff.shape[-1]
    TB, grid = _choose_batch_tile(B, max_rows_per_tile)

    return pl.pallas_call(
        _fused_affine_relu_kernel,
        out_shape=jax.ShapeDtypeStruct((B, A), jnp.float32),
        grid_spec=pltpu.PrefetchScalarGridSpec(
            num_scalar_prefetch=0,
            grid=(grid,),
            in_specs=[
                pl.BlockSpec((TB, F), lambda i: (i, 0)),      # streamed batch tiles
                pl.BlockSpec((F, A_pad), lambda i: (0, 0)),   # resident fused weight
                pl.BlockSpec((1, A), lambda i: (0, 0)),       # resident fused bias
            ],
            out_specs=pl.BlockSpec((TB, A), lambda i: (i, 0)),  # unpadded writeback
        ),
        compiler_params=pltpu.CompilerParams(
            dimension_semantics=("parallel",),      # megacore-shard the batch (v7x)
            vmem_limit_bytes=32 * 1024 * 1024,      # headroom for 8K-row tiles on v5e
        ),
    )(s, w_eff, b_eff)


def network_forward(s, w1, b1, w2, b2, *, max_rows_per_tile=8192):
    """Drop-in forward taking raw Linear params.  Prefer fuse_params() +
    network_forward_fused() so the fusion is hoisted to param-update time."""
    w_eff, b_eff = fuse_params(w1, b1, w2, b2)
    return network_forward_fused(s, w_eff, b_eff,
                                 max_rows_per_tile=max_rows_per_tile)


def init_params(key, feature_dim, action_dim, n_neuron=10):
    """Deterministic init mimicking PyTorch nn.Linear defaults
    (uniform(-1/sqrt(fan_in), 1/sqrt(fan_in)))."""
    k1, k2, k3, k4 = jax.random.split(key, 4)
    lim1 = 1.0 / jnp.sqrt(jnp.float32(feature_dim))
    lim2 = 1.0 / jnp.sqrt(jnp.float32(n_neuron))
    w1 = jax.random.uniform(k1, (feature_dim, n_neuron), jnp.float32, -lim1, lim1)
    b1 = jax.random.uniform(k2, (n_neuron,), jnp.float32, -lim1, lim1)
    w2 = jax.random.uniform(k3, (n_neuron, action_dim), jnp.float32, -lim2, lim2)
    b2 = jax.random.uniform(k4, (action_dim,), jnp.float32, -lim2, lim2)
    return w1, b1, w2, b2


if __name__ == "__main__":
    key = jax.random.PRNGKey(0)
    feature_dim, action_dim, n_neuron = 16, 4, 10
    batch = 8

    k_in, k_par = jax.random.split(key)
    s = jax.random.normal(k_in, (batch, feature_dim), jnp.float32)
    w1, b1, w2, b2 = init_params(k_par, feature_dim, action_dim, n_neuron)

    # Weight fusion hoisted out of the per-call forward (param-update time).
    w_eff, b_eff = fuse_params(w1, b1, w2, b2)
    fwd = jax.jit(network_forward_fused)

    q = jax.block_until_ready(fwd(s, w_eff, b_eff))
    ref = jnp.maximum((s @ w1 + b1) @ w2 + b2, 0.0)
    assert q.shape == (batch, action_dim)
    assert jnp.allclose(q, ref, atol=1e-4, rtol=1e-4)

    # Exercise the multi-step grid + ragged last tile path (no jnp.pad of s,
    # non-multiple-of-8 batch, OOB rows masked by Pallas).
    big_b = 300
    s_big = jax.random.normal(jax.random.PRNGKey(1), (big_b, feature_dim),
                              jnp.float32)
    q_big = jax.block_until_ready(fwd(s_big, w_eff, b_eff))
    ref_big = jnp.maximum((s_big @ w1 + b1) @ w2 + b2, 0.0)
    assert q_big.shape == (big_b, action_dim)
    assert jnp.allclose(q_big, ref_big, atol=1e-4, rtol=1e-4)

    print("KERNEL_OK")
</pallas_src>

<mosaic_0001>
module attributes {stable_mosaic.version = 11 : i64} {
  func.func @_fused_affine_relu_kernel(%arg0: i32, %arg1: memref<8x16xf32, #tpu.memory_space<vmem>>, %arg2: memref<16x128xf32, #tpu.memory_space<vmem>>, %arg3: memref<1x4xf32, #tpu.memory_space<vmem>>, %arg4: memref<8x4xf32, #tpu.memory_space<vmem>>) attributes {dimension_semantics = [#tpu.dimension_semantics<parallel>], iteration_bounds = array<i64: 1>, scalar_prefetch = 0 : i64, scratch_operands = 0 : i64, tpu.core_type = #tpu.core_type<tc>, window_params = [{transform_indices = @transform_0, window_bounds = array<i64: 8, 16>}, {pipeline_mode = #tpu.pipeline_mode<synchronous>, transform_indices = @transform_1, window_bounds = array<i64: 16, 128>}, {pipeline_mode = #tpu.pipeline_mode<synchronous>, transform_indices = @transform_2, window_bounds = array<i64: 1, 4>}, {transform_indices = @transform_3, window_bounds = array<i64: 8, 4>}]} {
    %c0 = arith.constant 0 : index
    %c0_0 = arith.constant 0 : index
    %0 = vector.load %arg1[%c0, %c0_0] : memref<8x16xf32, #tpu.memory_space<vmem>>, vector<8x16xf32>
    %c0_1 = arith.constant 0 : index
    %c0_2 = arith.constant 0 : index
    %1 = vector.load %arg2[%c0_1, %c0_2] : memref<16x128xf32, #tpu.memory_space<vmem>>, vector<16x128xf32>
    %cst = arith.constant dense<0.000000e+00> : vector<8x128xf32>
    %2 = tpu.matmul %0, %1, %cst {dimension_numbers = #tpu.dot_dimension_numbers<[1], [0], [0], [1], [0, 0, 1, 1], [], []>} : vector<8x16xf32>, vector<16x128xf32>, vector<8x128xf32> -> vector<8x128xf32>
    %3 = vector.extract_strided_slice %2 {offsets = [0, 0], sizes = [8, 4], strides = [1, 1]} : vector<8x128xf32> to vector<8x4xf32>
    %c0_3 = arith.constant 0 : index
    %c0_4 = arith.constant 0 : index
    %4 = vector.load %arg3[%c0_3, %c0_4] : memref<1x4xf32, #tpu.memory_space<vmem>>, vector<1x4xf32>
    %5 = vector.broadcast %4 : vector<1x4xf32> to vector<8x4xf32>
    %6 = arith.addf %3, %5 : vector<8x4xf32>
    %cst_5 = arith.constant 0.000000e+00 : f32
    %7 = vector.broadcast %cst_5 : f32 to vector<8x4xf32>
    %8 = arith.maximumf %6, %7 : vector<8x4xf32>
    %c0_6 = arith.constant 0 : index
    %c0_7 = arith.constant 0 : index
    %9 = vector.load %arg4[%c0_6, %c0_7] : memref<8x4xf32, #tpu.memory_space<vmem>>, vector<8x4xf32>
    tpu.vector_store %arg4[%c0_6, %c0_7], %8 {strides = array<i32>} : memref<8x4xf32, #tpu.memory_space<vmem>>, vector<8x4xf32>,
    return
  }
  func.func @transform_0(%arg0: i32) -> (i32, i32) {
    %c0_i32 = arith.constant 0 : i32
    %c0_i32_0 = arith.constant 0 : i32
    return %arg0, %c0_i32 : i32, i32
  }
  func.func @transform_1(%arg0: i32) -> (i32, i32) {
    %c0_i32 = arith.constant 0 : i32
    %c0_i32_0 = arith.constant 0 : i32
    %c0_i32_1 = arith.constant 0 : i32
    return %c0_i32, %c0_i32_0 : i32, i32
  }
  func.func @transform_2(%arg0: i32) -> (i32, i32) {
    %c0_i32 = arith.constant 0 : i32
    %c0_i32_0 = arith.constant 0 : i32
    %c0_i32_1 = arith.constant 0 : i32
    return %c0_i32, %c0_i32_0 : i32, i32
  }
  func.func @transform_3(%arg0: i32) -> (i32, i32) {
    %c0_i32 = arith.constant 0 : i32
    %c0_i32_0 = arith.constant 0 : i32
    return %arg0, %c0_i32 : i32, i32
  }
}

</mosaic_0001>

<bundles_post_ra>
// kernel: network_forward_fused.1
= control target key start
LH: loop header
LB: loop body
LE: loop exit
PB: predicated region body
PF: predicated region fallthrough
CT: control target
= control target key end

     0   :  { %8 = vsyncpa [#allocation3], 0  ;;  %s179_s0 = inlined_call_operand.hbm [shape: f32[8,16], index: 0, kind: input, shape index: {}]   ;;  %s180_s1 = inlined_call_operand.hbm [shape: f32[16,128], index: 1, kind: input, shape index: {}]   ;;  %s181_s2 = inlined_call_operand.vmem [shape: f32[1,4], index: 2, kind: input, shape index: {}]   ;;  %s182_s3 = inlined_call_operand.vmem [shape: f32[8,4], index: 3, kind: output, shape index: {}]  }
   0x1   :  { %s15_s14 = sshll.u32 %s179_s0, 4  ;;  %s16_s14 = int_to_ptr.hbm [resolvable:$true] %s15_s14 }
   0x2   :  { %9 = vsyncpa [#allocation5], 0  ;;  %s143_s15 = smov [#allocation2]   ;;  %s25_s19 = sshll.u32 %s180_s1, 4  ;;  %s26_s19 = int_to_ptr.hbm [resolvable:$true] %s25_s19 }
   0x3   :  { %s17_s16 = sshll.u32 %s143_s15, 4  ;;  %s144_s20 = smov [#allocation4]   ;;  %s18_s16 = int_to_ptr.vmem [resolvable:$true] %s17_s16 }
   0x4   :  { %20 = dma.hbm_to_vmem [thread:$0]  %s16_s14, 128, %s18_s16, [#allocation3]  }
   0x5   :  { %s27_s21 = sshll.u32 %s144_s20, 4  ;;  %s145_s22 = smov 128   ;;  %s28_s21 = int_to_ptr.vmem [resolvable:$true] %s27_s21 }
   0x6   :  { %s146_s23 = smov 8  }
   0x7   :  { %33 = dma.hbm_to_vmem [thread:$0]  %s26_s19, 256, %s28_s21, [#allocation5], %s145_s22, %s145_s22, %s146_s23  }
   0x8   :  { %139 = dma.done.wait [#allocation3], 128  }
   0x9   :  { %140 = vsyncadd [#allocation3], 4294967168 }
   0xa   :  { %141 = dma.done.wait [#allocation5], 256  }
   0xb   :  { %142 = vsyncadd [#allocation5], 4294967040  ;;  %v46_v0 = vld [vmem:[#allocation4 + $0x8] sm:$0xff]  ;;  %v45_v1 = vld [vmem:[#allocation4] sm:$0xff]  ;;  %vm47_vm0 = vcmask 130048   ;;  %vm77_vm1 = vcmask 31744  }
   0xc   :  { %65 = vmatpush.msra.mxu0 %v46_v0  ;;  %v44_v2 = vld [vmem:[#allocation2] sm:$0xff] }
   0xd   :  { %v90_v3 = vld [vmem:[%s181_s2] ss:$0 sm:$0xff] }
   0xe   :  { %66 = vmatpush.msra.mxu0 %v45_v1 }
   0xf   :  { %85 = vmatmul.msk.f32.vlgmr.msra.gmra.mxu0 %vm47_vm0, %v44_v2 }
  0x8c   :  { %v68_v4 = vpop.f32.mrf.mxu0 }
  0x8d   :  { %v75_v5 = vadd.f32 %v90_v3, %v68_v4 }
  0x8f   :  { %v76_v6 = vmax.f32 %v75_v5, 0.0 }
  0x91   :  { %78 = vst.msk [vmem:[%s182_s3] sm:$0xff] %vm77_vm1, %v76_v6 }
  0x92   :  { %83 = vsyncpa [#allocation3], 1 }
  0x93   :  { %84 = vsyncpa [#allocation5], 1 }

</bundles_post_ra>
